<compile_context>
chip_gen: v7x
topology: tpu7x:2x2x1
jax: 0.10.0
libtpu: 0.0.40
codegen_flags: <defaults>
</compile_context>

<pallas_src>
import functools

import jax
import jax.numpy as jnp
from jax.experimental import pallas as pl
from jax.experimental.pallas import tpu as pltpu


def _round_up(x, m):
    return ((x + m - 1) // m) * m


def _vmem_capacity_bytes():
    """Best-effort VMEM capacity query; falls back to the v7x size (64 MiB)."""
    try:
        return int(pltpu.get_tpu_info().vmem_capacity_bytes)
    except Exception:
        return 64 * 1024 * 1024


def _step_vmem_bytes(nt, *, T, T_out, Kt, C_in, C_lanes, C_out,
                     x_itemsize, out_itemsize):
    """Rough per-grid-step VMEM footprint for a node tile of size nt."""
    x_blk = T * nt * C_in * x_itemsize
    o_blk = T_out * nt * C_out * out_itemsize
    w_b = Kt * C_in * C_lanes * 2 + C_lanes * 4            # bf16 weights + f32 bias
    r = T_out * nt
    interm = T * nt * C_in * 2 + 3 * r * C_lanes * 4        # bf16 x cast + acc/q/gate f32
    return 2 * (x_blk + o_blk) + 2 * w_b + interm            # in/out double-buffered


def _pick_node_tile(N, B, budget_bytes, step_bytes_fn):
    """Largest multiple-of-8 divisor of N under the VMEM budget; prefers a
    grid of >= 2 programs so both v7x TensorCores get work."""
    cands = [nt for nt in range(8, N + 1, 8) if N % nt == 0]
    if not cands:
        cands = [N]                       # N < 8 or no multiple-of-8 divisor
    cands = sorted(set(cands), reverse=True)
    fits = [nt for nt in cands if step_bytes_fn(nt) <= budget_bytes] or [min(cands)]
    for nt in fits:
        if B * (N // nt) >= 2:
            return nt
    return fits[0]


def pack_temporal_params(w, b, *, compute_dtype=jnp.bfloat16):
    """Pack conv weights/bias ONCE at parameter-load time.

    w: (Kt, C_in, 2*C_out) per-tap matmul weights (w[k, c, o] == conv.weight[o, c, k, 0]).
    b: (2*C_out,) conv bias.
    Returns:
      w_packed: (Kt, C_in, C_lanes) in compute_dtype, P at lanes [0, C_out),
                Q at lanes [C_lanes//2, C_lanes//2 + C_out), zeros elsewhere.
      b_packed: (1, C_lanes) float32, same lane packing.
    """
    Kt, C_in, two_c = w.shape
    assert two_c % 2 == 0
    C_out = two_c // 2
    C_lanes = _round_up(2 * C_out, 128)
    C_half = C_lanes // 2

    wf = w.astype(jnp.float32)
    w_packed = jnp.zeros((Kt, C_in, C_lanes), jnp.float32)
    w_packed = w_packed.at[:, :, :C_out].set(wf[:, :, :C_out])
    w_packed = w_packed.at[:, :, C_half:C_half + C_out].set(wf[:, :, C_out:])

    b_packed = jnp.zeros((1, C_lanes), jnp.float32)
    b_packed = b_packed.at[0, :C_out].set(b[:C_out].astype(jnp.float32))
    b_packed = b_packed.at[0, C_half:C_half + C_out].set(b[C_out:].astype(jnp.float32))
    return w_packed.astype(compute_dtype), b_packed


def _temporal_block_kernel(x_ref, w_ref, b_ref, o_ref, *, Kt, T_out, Nt, C_out,
                           C_lanes, compute_dtype, approx_gate):
    # x_ref : (1, T, Nt, C_in)       input dtype (cast to compute dtype here)
    # w_ref : (Kt, C_in, C_lanes)    compute dtype; P @ [0,C_out), Q @ [C_half, C_half+C_out)
    # b_ref : (1, C_lanes)           f32, same lane packing
    # o_ref : (1, T_out, Nt, C_out)  compact output block (no channel padding)
    T = T_out + Kt - 1
    C_in = x_ref.shape[-1]
    R = T_out * Nt
    C_half = C_lanes // 2

    # Activation stays in its HBM dtype; cast on the VPU right before the MXU.
    x2 = x_ref[0].reshape(T * Nt, C_in)

    def tap(k):
        xk = x2[k * Nt:k * Nt + R, :].astype(compute_dtype)
        return jnp.dot(xk, w_ref[k], preferred_element_type=jnp.float32)

    # Per-tap MXU matmuls accumulated in f32; bias folded into tap 0.
    acc = tap(0) + b_ref[...]
    for k in range(1, Kt):
        acc = acc + tap(k)

    # GLU: Q lives exactly C_half lanes above P, so a half-rotation aligns it
    # with P's lanes.  (A rotation by C_lanes/2 is its own inverse, so the
    # result does not depend on the rotate direction.)  Lands on the XLU slot.
    q = pltpu.roll(acc, shift=C_half, axis=1)
    if approx_gate:
        gate = pl.reciprocal(1.0 + jnp.exp(-q), approx=True)   # EUP exp + vrcp
    else:
        gate = 1.0 / (1.0 + jnp.exp(-q))
    glu = (acc * gate).reshape(T_out, Nt, C_lanes)

    # Compact store: only the C_out valid lanes go to HBM.
    o_ref[0] = glu[:, :, :C_out].astype(o_ref.dtype)


def temporal_block(x, w_packed, b_packed, *, Kt, out_channels, node_tile=None,
                   out_dtype=None, compute_dtype=jnp.bfloat16, approx_gate=True):
    """x: (B, T, N, C_in); packed params from pack_temporal_params().

    Returns (B, T - Kt + 1, N, out_channels) in out_dtype (defaults to x.dtype;
    pass jnp.bfloat16 to halve output writeback bytes when the downstream layer
    runs in bf16).
    """
    B, T, N, C_in = x.shape
    T_out = T - Kt + 1
    if T_out < 1:
        raise ValueError("T must be >= Kt")
    C_out = out_channels
    C_lanes = w_packed.shape[-1]
    if w_packed.shape != (Kt, C_in, C_lanes) or C_lanes < 2 * C_out:
        raise ValueError("w_packed shape does not match (Kt, C_in, C_lanes)")
    out_dtype = x.dtype if out_dtype is None else out_dtype
    out_itemsize = jnp.dtype(out_dtype).itemsize

    step_bytes = functools.partial(
        _step_vmem_bytes, T=T, T_out=T_out, Kt=Kt, C_in=C_in, C_lanes=C_lanes,
        C_out=C_out, x_itemsize=x.dtype.itemsize, out_itemsize=out_itemsize)

    vmem_cap = max(_vmem_capacity_bytes(), 64 * 1024 * 1024)
    max_limit = max(min(vmem_cap - (16 << 20), 112 << 20), 32 << 20)

    if node_tile is None:
        node_tile = _pick_node_tile(N, B, int(0.7 * max_limit), step_bytes)
    if N % node_tile != 0 or not (node_tile == N or node_tile % 8 == 0):
        raise ValueError("node_tile must divide N and be a multiple of 8 (or == N)")
    # TODO(synk): if N is not a multiple of 8, padding N to 8 in the caller
    # keeps all in-kernel row slices / reshapes sublane-tile aligned (at the
    # cost of one extra HBM pass over x).

    vmem_limit = int(min(max_limit, max(32 << 20, int(1.4 * step_bytes(node_tile)))))

    kernel = functools.partial(
        _temporal_block_kernel, Kt=Kt, T_out=T_out, Nt=node_tile, C_out=C_out,
        C_lanes=C_lanes, compute_dtype=compute_dtype, approx_gate=approx_gate)

    flops = 2 * B * T_out * N * Kt * C_in * (2 * C_out)
    transcendentals = B * T_out * N * C_out
    bytes_accessed = (x.size * x.dtype.itemsize
                      + w_packed.size * w_packed.dtype.itemsize
                      + b_packed.size * b_packed.dtype.itemsize
                      + B * T_out * N * C_out * out_itemsize)

    return pl.pallas_call(
        kernel,
        out_shape=jax.ShapeDtypeStruct((B, T_out, N, C_out), out_dtype),
        grid_spec=pltpu.PrefetchScalarGridSpec(
            num_scalar_prefetch=0,
            grid=(B, N // node_tile),
            in_specs=[
                pl.BlockSpec((1, T, node_tile, C_in),
                             lambda bi, nj: (bi, 0, nj, 0)),
                pl.BlockSpec((Kt, C_in, C_lanes), lambda bi, nj: (0, 0, 0)),
                pl.BlockSpec((1, C_lanes), lambda bi, nj: (0, 0)),
            ],
            out_specs=pl.BlockSpec((1, T_out, node_tile, C_out),
                                   lambda bi, nj: (bi, 0, nj, 0)),
        ),
        compiler_params=pltpu.CompilerParams(
            dimension_semantics=("parallel", "parallel"),
            vmem_limit_bytes=vmem_limit,
        ),
        cost_estimate=pl.CostEstimate(flops=flops,
                                      transcendentals=transcendentals,
                                      bytes_accessed=bytes_accessed),
    )(x, w_packed, b_packed)


def temporal_block_ref(x, w, b, *, Kt, out_channels):
    """Pure-JAX f32 reference (mirrors the PyTorch Conv2d((Kt,1)) + GLU)."""
    B, T, N, C_in = x.shape
    T_out = T - Kt + 1
    acc = jnp.zeros((B, T_out, N, 2 * out_channels), jnp.float32) + b.astype(jnp.float32)
    for k in range(Kt):
        acc = acc + jnp.einsum("btnc,cd->btnd",
                               x[:, k:k + T_out].astype(jnp.float32),
                               w[k].astype(jnp.float32))
    P = acc[..., :out_channels]
    Q = acc[..., out_channels:]
    return (P * jax.nn.sigmoid(Q)).astype(x.dtype)


if __name__ == "__main__":
    in_channels = 4
    out_channels = 8
    Kt = 3
    B, T, N = 2, 10, 16

    key = jax.random.PRNGKey(0)
    kx, kw, kb = jax.random.split(key, 3)

    x = jax.random.normal(kx, (B, T, N, in_channels), dtype=jnp.float32)

    # Deterministic Conv2d-style init: weight (2*C_out, C_in, Kt, 1), bias (2*C_out,)
    fan_in = in_channels * Kt * 1
    bound = 1.0 / (fan_in ** 0.5)
    w_torch = jax.random.uniform(
        kw, (2 * out_channels, in_channels, Kt, 1),
        minval=-bound, maxval=bound, dtype=jnp.float32)
    bias = jax.random.uniform(
        kb, (2 * out_channels,), minval=-bound, maxval=bound, dtype=jnp.float32)

    # Per-tap matmul form: (Kt, C_in, 2*C_out)
    w = jnp.transpose(w_torch[..., 0], (2, 1, 0))

    # Pack once at parameter-load time (hoisted out of the per-step call).
    w_packed, b_packed = pack_temporal_params(w, bias)

    fn = jax.jit(functools.partial(
        temporal_block, Kt=Kt, out_channels=out_channels))
    out = jax.block_until_ready(fn(x, w_packed, b_packed))

    ref = temporal_block_ref(x, w, bias, Kt=Kt, out_channels=out_channels)
    assert out.shape == (B, T - Kt + 1, N, out_channels), out.shape
    err = float(jnp.max(jnp.abs(out.astype(jnp.float32) - ref.astype(jnp.float32))))
    # Tolerance relaxed for bf16 matmul operands (f32 accumulation) and the
    # approximate EUP reciprocal in the sigmoid; pass approx_gate=False and
    # compute_dtype=jnp.float32 for a tighter match.
    assert err < 5e-2, err

    print("KERNEL_OK")
</pallas_src>

<mosaic_0001>
module attributes {stable_mosaic.version = 11 : i64} {
  func.func @_temporal_block_kernel(%arg0: i32, %arg1: i32, %arg2: memref<1x10x16x4xf32, #tpu.memory_space<vmem>>, %arg3: memref<3x4x128xbf16, #tpu.memory_space<vmem>>, %arg4: memref<1x128xf32, #tpu.memory_space<vmem>>, %arg5: memref<1x8x16x8xf32, #tpu.memory_space<vmem>>) attributes {dimension_semantics = [#tpu.dimension_semantics<parallel>, #tpu.dimension_semantics<parallel>], iteration_bounds = array<i64: 2, 1>, scalar_prefetch = 0 : i64, scratch_operands = 0 : i64, tpu.core_type = #tpu.core_type<tc>, window_params = [{transform_indices = @transform_0, window_bounds = array<i64: 1, 10, 16, 4>}, {pipeline_mode = #tpu.pipeline_mode<synchronous>, transform_indices = @transform_1, window_bounds = array<i64: 3, 4, 128>}, {pipeline_mode = #tpu.pipeline_mode<synchronous>, transform_indices = @transform_2, window_bounds = array<i64: 1, 128>}, {transform_indices = @transform_3, window_bounds = array<i64: 1, 8, 16, 8>}]} {
    %c0 = arith.constant 0 : index
    %c0_0 = arith.constant 0 : index
    %c0_1 = arith.constant 0 : index
    %c0_2 = arith.constant 0 : index
    %0 = vector.load %arg2[%c0, %c0_0, %c0_1, %c0_2] : memref<1x10x16x4xf32, #tpu.memory_space<vmem>>, vector<1x10x16x4xf32>
    %1 = vector.shape_cast %0 : vector<1x10x16x4xf32> to vector<10x16x4xf32>
    %2 = vector.shape_cast %1 : vector<10x16x4xf32> to vector<160x4xf32>
    %3 = vector.extract_strided_slice %2 {offsets = [0, 0], sizes = [128, 4], strides = [1, 1]} : vector<160x4xf32> to vector<128x4xf32>
    %4 = arith.truncf %3 : vector<128x4xf32> to vector<128x4xbf16>
    %c0_3 = arith.constant 0 : index
    %c0_4 = arith.constant 0 : index
    %c0_5 = arith.constant 0 : index
    %5 = vector.load %arg3[%c0_3, %c0_4, %c0_5] : memref<3x4x128xbf16, #tpu.memory_space<vmem>>, vector<1x4x128xbf16>
    %6 = vector.shape_cast %5 : vector<1x4x128xbf16> to vector<4x128xbf16>
    %cst = arith.constant dense<0.000000e+00> : vector<128x128xf32>
    %7 = tpu.matmul %4, %6, %cst {dimension_numbers = #tpu.dot_dimension_numbers<[1], [0], [0], [1], [0, 0, 1, 1], [], []>} : vector<128x4xbf16>, vector<4x128xbf16>, vector<128x128xf32> -> vector<128x128xf32>
    %c0_6 = arith.constant 0 : index
    %c0_7 = arith.constant 0 : index
    %8 = vector.load %arg4[%c0_6, %c0_7] : memref<1x128xf32, #tpu.memory_space<vmem>>, vector<1x128xf32>
    %9 = vector.broadcast %8 : vector<1x128xf32> to vector<128x128xf32>
    %10 = arith.addf %7, %9 : vector<128x128xf32>
    %11 = vector.extract_strided_slice %2 {offsets = [16, 0], sizes = [128, 4], strides = [1, 1]} : vector<160x4xf32> to vector<128x4xf32>
    %12 = arith.truncf %11 : vector<128x4xf32> to vector<128x4xbf16>
    %c1 = arith.constant 1 : index
    %c0_8 = arith.constant 0 : index
    %c0_9 = arith.constant 0 : index
    %13 = vector.load %arg3[%c1, %c0_8, %c0_9] : memref<3x4x128xbf16, #tpu.memory_space<vmem>>, vector<1x4x128xbf16>
    %14 = vector.shape_cast %13 : vector<1x4x128xbf16> to vector<4x128xbf16>
    %cst_10 = arith.constant dense<0.000000e+00> : vector<128x128xf32>
    %15 = tpu.matmul %12, %14, %cst_10 {dimension_numbers = #tpu.dot_dimension_numbers<[1], [0], [0], [1], [0, 0, 1, 1], [], []>} : vector<128x4xbf16>, vector<4x128xbf16>, vector<128x128xf32> -> vector<128x128xf32>
    %16 = arith.addf %10, %15 : vector<128x128xf32>
    %17 = vector.extract_strided_slice %2 {offsets = [32, 0], sizes = [128, 4], strides = [1, 1]} : vector<160x4xf32> to vector<128x4xf32>
    %18 = arith.truncf %17 : vector<128x4xf32> to vector<128x4xbf16>
    %c2 = arith.constant 2 : index
    %c0_11 = arith.constant 0 : index
    %c0_12 = arith.constant 0 : index
    %19 = vector.load %arg3[%c2, %c0_11, %c0_12] : memref<3x4x128xbf16, #tpu.memory_space<vmem>>, vector<1x4x128xbf16>
    %20 = vector.shape_cast %19 : vector<1x4x128xbf16> to vector<4x128xbf16>
    %cst_13 = arith.constant dense<0.000000e+00> : vector<128x128xf32>
    %21 = tpu.matmul %18, %20, %cst_13 {dimension_numbers = #tpu.dot_dimension_numbers<[1], [0], [0], [1], [0, 0, 1, 1], [], []>} : vector<128x4xbf16>, vector<4x128xbf16>, vector<128x128xf32> -> vector<128x128xf32>
    %22 = arith.addf %16, %21 : vector<128x128xf32>
    %c64_i32 = arith.constant 64 : i32
    %23 = tpu.dynamic_rotate %22 by %c64_i32 dim 1 : vector<128x128xf32>, i32 -> vector<128x128xf32>
    %cst_14 = arith.constant 0.000000e+00 : f32
    %24 = vector.broadcast %cst_14 : f32 to vector<128x128xf32>
    %25 = arith.subf %24, %23 : vector<128x128xf32>
    %26 = math.exp %25 : vector<128x128xf32>
    %cst_15 = arith.constant 1.000000e+00 : f32
    %27 = vector.broadcast %cst_15 : f32 to vector<128x128xf32>
    %28 = arith.addf %27, %26 : vector<128x128xf32>
    %29 = tpu.reciprocal %28 {approx = true} : vector<128x128xf32> -> vector<128x128xf32>
    %30 = arith.mulf %22, %29 : vector<128x128xf32>
    %31 = vector.shape_cast %30 : vector<128x128xf32> to vector<8x16x128xf32>
    %32 = vector.extract_strided_slice %31 {offsets = [0, 0, 0], sizes = [8, 16, 8], strides = [1, 1, 1]} : vector<8x16x128xf32> to vector<8x16x8xf32>
    %c0_16 = arith.constant 0 : index
    %c0_17 = arith.constant 0 : index
    %c0_18 = arith.constant 0 : index
    %c0_19 = arith.constant 0 : index
    %33 = vector.load %arg5[%c0_16, %c0_17, %c0_18, %c0_19] : memref<1x8x16x8xf32, #tpu.memory_space<vmem>>, vector<1x8x16x8xf32>
    %34 = vector.shape_cast %33 : vector<1x8x16x8xf32> to vector<8x16x8xf32>
    %35 = vector.shape_cast %32 : vector<8x16x8xf32> to vector<1x8x16x8xf32>
    tpu.vector_store %arg5[%c0_16, %c0_17, %c0_18, %c0_19], %35 {strides = array<i32>} : memref<1x8x16x8xf32, #tpu.memory_space<vmem>>, vector<1x8x16x8xf32>,
    return
  }
  func.func @transform_0(%arg0: i32, %arg1: i32) -> (i32, i32, i32, i32) {
    %c0_i32 = arith.constant 0 : i32
    %c0_i32_0 = arith.constant 0 : i32
    %c0_i32_1 = arith.constant 0 : i32
    return %arg0, %c0_i32, %arg1, %c0_i32_0 : i32, i32, i32, i32
  }
  func.func @transform_1(%arg0: i32, %arg1: i32) -> (i32, i32, i32) {
    %c0_i32 = arith.constant 0 : i32
    %c0_i32_0 = arith.constant 0 : i32
    %c0_i32_1 = arith.constant 0 : i32
    %c0_i32_2 = arith.constant 0 : i32
    return %c0_i32, %c0_i32_0, %c0_i32_1 : i32, i32, i32
  }
  func.func @transform_2(%arg0: i32, %arg1: i32) -> (i32, i32) {
    %c0_i32 = arith.constant 0 : i32
    %c0_i32_0 = arith.constant 0 : i32
    %c0_i32_1 = arith.constant 0 : i32
    return %c0_i32, %c0_i32_0 : i32, i32
  }
  func.func @transform_3(%arg0: i32, %arg1: i32) -> (i32, i32, i32, i32) {
    %c0_i32 = arith.constant 0 : i32
    %c0_i32_0 = arith.constant 0 : i32
    %c0_i32_1 = arith.constant 0 : i32
    return %arg0, %c0_i32, %arg1, %c0_i32_0 : i32, i32, i32, i32
  }
}

</mosaic_0001>

<bundles_post_ra>
// kernel: temporal_block.1
= control target key start
LH: loop header
LB: loop body
LE: loop exit
PB: predicated region body
PF: predicated region fallthrough
CT: control target
= control target key end

     0   :  { %s1157_s12 = smov 0   ;;  %s1159_s13 = smov 0   ;;  %s1391_s0 = inlined_call_operand.vmem [shape: f32[2,10,16,4], index: 0, kind: input, shape index: {}]   ;;  %s1392_s1 = inlined_call_operand.vmem [shape: bf16[3,4,128], index: 1, kind: input, shape index: {}]   ;;  %s1393_s2 = inlined_call_operand.vmem [shape: f32[1,128], index: 2, kind: input, shape index: {}]   ;;  %s1394_s3 = inlined_call_operand.vmem [shape: f32[2,8,16,8], index: 3, kind: output, shape index: {}]  }
   0x1   :  { %s1161_s14 = smov 0  }
   0x2 LB: > { %s25_s15 = sadd.s32 1, %s1130_s13  ;;  %p853_p0 = scmp.ge.s32.totalorder %s1134_s14, 1  ;;  %s1134_s14 = sphi %s1161_s14, %s13_s14   ;;  %s1130_s13 = sphi %s1159_s13, %s1396_s13   ;;  %s1126_s12 = sphi %s1157_s12, %s1395_s12  }
   0x3   : > { %p27_p1 = scmp.ge.s32.totalorder %s25_s15, 2  ;;  %p158_p2 = scmp.lt.s32.totalorder %s1134_s14, 3 }
   0x5   : > { %s1398_s15 = smov (%p27_p1, %s25_s15), 0  ;;  %p159_p3 = pnand %p853_p0, %p158_p2 }
   0x6   : > { %v239_v0 = vld [vmem:[%s1392_s1] sm:$0x3] (!%p159_p3)  ;;  %vm272_vm0 = vcmask (!%p159_p3), 1041408   ;;  %v866_v1 = vld [vmem:[%s1392_s1 + $0x2] sm:$0x3] (!%p159_p3)  ;;  %p191_p4 = scmp.lt.s32.totalorder (!%p159_p3), %s1126_s12, 1 }
   0x7   : > { %162 = sbr.rel (%p159_p3) target bundleno = 434 (0x1b2), region = 32  ;;  %1018 = vmatprep.subr.msk.bf16.mxu1 (!%p159_p3), %vm272_vm0, %v239_v0  ;;  %v274_v2 = vsel (!%p159_p3), %vm272_vm0, %v239_v0, 0  ;;  %1019 = vmatprep.subr.msk.bf16.mxu0 (!%p159_p3), %vm272_vm0, %v866_v1  ;;  %v380_v3 = vsel (!%p159_p3), %vm272_vm0, %v866_v1, 0  ;;  %v875_v4 = vld [vmem:[%s1392_s1 + $0x4] sm:$0x3] (!%p159_p3)  ;;  %vm247_vm1 = vcmask (!%p159_p3), 31744  }
   0x8   : > { %915 = vmatpush3.bf16.msra.mxu1 (!%p159_p3), %v274_v2  ;;  %933 = vmatpush3.bf16.msra.mxu0 (!%p159_p3), %v380_v3  ;;  %v502_v16 = vsel (!%p159_p3), %vm272_vm0, %v875_v4, 0  ;;  %v1246_v44 = vld [vmem:[%s1393_s2] ss:$0 sm:$0xff] (!%p159_p3)  ;;  %s1136_s28 = smov (!%p159_p3), 64   ;;  %vm745_vm2 = vcmask (!%p159_p3), 64512  }
   0x9   : > { %1020 = vmatprep.subr.msk.bf16.mxu1 (!%p159_p3), %vm272_vm0, %v866_v1  ;;  %1021 = vmatprep.subr.msk.bf16.mxu0 (!%p159_p3), %vm272_vm0, %v875_v4 }
   0xe   : > { %s1400_s12 = smov (!%p191_p4, %s1126_s12), 1 }
   0xf   : > { %s1022_s22 = smul.u32 160, %s1400_s12  ;;  %s886_s29 = sshll.u32 %s1400_s12, 7 }
  0x10   : > { %s1332_s5 = scalar_lea.vmem %s1394_s3, %s886_s29 }
  0x11   : > { %s1196_s25 = scalar_lea.vmem %s1391_s0, %s1022_s22 }
  0x12   : > { %v211_v5 = vld [vmem:[%s1196_s25] sm:$0xff]  ;;  %v212_v6 = vld [vmem:[%s1196_s25 + $0x8] sm:$0xff]  ;;  %v213_v7 = vld [vmem:[%s1196_s25 + $0x10] sm:$0xff] }
  0x13   : > { %v231_v8 = vpack.c.bf16 %v212_v6, %v211_v5  ;;  %v214_v9 = vld [vmem:[%s1196_s25 + $0x18] sm:$0xff]  ;;  %v215_v10 = vld [vmem:[%s1196_s25 + $0x20] sm:$0xff]  ;;  %v216_v11 = vld [vmem:[%s1196_s25 + $0x28] sm:$0xff] }
  0x14   : > { %v232_v12 = vpack.c.bf16 %v214_v9, %v213_v7  ;;  %v233_v13 = vpack.c.bf16 %v216_v11, %v215_v10  ;;  %v217_v14 = vld [vmem:[%s1196_s25 + $0x30] sm:$0xff]  ;;  %v218_v15 = vld [vmem:[%s1196_s25 + $0x38] sm:$0xff]  ;;  %v219_v18 = vld [vmem:[%s1196_s25 + $0x40] sm:$0xff] }
  0x15   : > { %916 = vmatprep.mubr.msk.bf16.mxu1 %vm247_vm1, %v231_v8  ;;  %v234_v17 = vpack.c.bf16 %v218_v15, %v217_v14  ;;  %v220_v19 = vld [vmem:[%s1196_s25 + $0x48] sm:$0xff]  ;;  %v221_v21 = vld [vmem:[%s1196_s25 + $0x50] sm:$0xff]  ;;  %v222_v22 = vld [vmem:[%s1196_s25 + $0x58] sm:$0xff] }
  0x16   : > { %934 = vmatprep.mubr.msk.bf16.mxu0 %vm247_vm1, %v232_v12  ;;  %917 = vmatmul.mubr.msk.bf16.vlgmr.msra.gmra.mrb[0].mxu1 %vm247_vm1, %v232_v12  ;;  %v235_v20 = vpack.c.bf16 %v220_v19, %v219_v18  ;;  %v223_v23 = vld [vmem:[%s1196_s25 + $0x60] sm:$0xff]  ;;  %v224_v24 = vld [vmem:[%s1196_s25 + $0x68] sm:$0xff]  ;;  %v236_v25 = vpack.c.bf16 %v222_v22, %v221_v21  ;;  %v225_v27 = vld [vmem:[%s1196_s25 + $0x70] sm:$0xff] }
  0x17   : > { %969 = vmatpush3.bf16.msra.mxu1 %v380_v3  ;;  %935 = vmatmul.mubr.msk.bf16.vlgmr.msra.gmra.mrb[0].mxu0 %vm247_vm1, %v233_v13  ;;  %v237_v26 = vpack.c.bf16 %v224_v24, %v223_v23  ;;  %v226_v28 = vld [vmem:[%s1196_s25 + $0x78] sm:$0xff]  ;;  %v227_v30 = vld [vmem:[%s1196_s25 + $0x80] sm:$0xff]  ;;  %v228_v31 = vld [vmem:[%s1196_s25 + $0x88] sm:$0xff] }
  0x18   : > { %951 = vmatpush3.bf16.msra.mxu0 %v502_v16  ;;  %920 = vmatprep.mubr.msk.bf16.mxu1 %vm247_vm1, %v233_v13  ;;  %v238_v29 = vpack.c.bf16 %v226_v28, %v225_v27  ;;  %v373_v32 = vpack.c.bf16 %v228_v31, %v227_v30  ;;  %v229_v33 = vld [vmem:[%s1196_s25 + $0x90] sm:$0xff]  ;;  %v230_v34 = vld [vmem:[%s1196_s25 + $0x98] sm:$0xff] }
  0x19   : > { %938 = vmatprep.mubr.msk.bf16.mxu0 %vm247_vm1, %v234_v17  ;;  %v495_v35 = vpack.c.bf16 %v230_v34, %v229_v33 }
  0x1e   : > { %921 = vmatmul.mubr.msk.bf16.gmra.mrb[4].mxu1 %vm247_vm1, %v234_v17 }
  0x1f   : > { %939 = vmatmul.mubr.msk.bf16.gmra.mrb[4].mxu0 %vm247_vm1, %v235_v20  ;;  %924 = vmatprep.mubr.msk.bf16.mxu1 %vm247_vm1, %v235_v20 }
  0x20   : > { %952 = vmatprep.mubr.msk.bf16.mxu0 %vm247_vm1, %v233_v13 }
  0x26   : > { %925 = vmatmul.mubr.msk.bf16.gmra.mrb[8].mxu1 %vm247_vm1, %v236_v25 }
  0x27   : > { %953 = vmatmul.mubr.msk.bf16.vlgmr.msra.gmra.mrb[0].mxu0 %vm247_vm1, %v234_v17  ;;  %928 = vmatprep.mubr.msk.bf16.mxu1 %vm247_vm1, %v237_v26 }
  0x28   : > { %956 = vmatprep.mubr.msk.bf16.mxu0 %vm247_vm1, %v235_v20 }
  0x2e   : > { %929 = vmatmul.mubr.msk.bf16.gmra.mrb[12].mxu1 %vm247_vm1, %v238_v29 }
  0x2f   : > { %957 = vmatmul.mubr.msk.bf16.gmra.mrb[4].mxu0 %vm247_vm1, %v236_v25  ;;  %942 = vmatprep.mubr.msk.bf16.mxu1 %vm247_vm1, %v236_v25 }
  0x30   : > { %960 = vmatprep.mubr.msk.bf16.mxu0 %vm247_vm1, %v237_v26 }
  0x36   : > { %943 = vmatmul.mubr.msk.bf16.vlgmr.msra.gmra.mrb[8].mxu1 %vm247_vm1, %v237_v26 }
  0x37   : > { %961 = vmatmul.mubr.msk.bf16.gmra.mrb[8].mxu0 %vm247_vm1, %v238_v29  ;;  %946 = vmatprep.mubr.msk.bf16.mxu1 %vm247_vm1, %v238_v29 }
  0x38   : > { %964 = vmatprep.mubr.msk.bf16.mxu0 %vm247_vm1, %v373_v32 }
  0x3e   : > { %947 = vmatmul.mubr.msk.bf16.gmra.mrb[12].mxu1 %vm247_vm1, %v373_v32 }
  0x3f   : > { %965 = vmatmul.mubr.msk.bf16.gmra.mrb[12].mxu0 %vm247_vm1, %v495_v35 }
  0xe9   : > { %v918_v36 = vpop.f32.mrb[0].mxu1 }
  0xea   : > { %v310_v37 = vpop.f32.mrb[1].mxu1  ;;  %v319_v45 = vadd.f32 %v918_v36, %v1246_v44 }
  0xeb   : > { %v919_v38 = vpop.f32.mrb[2].mxu1  ;;  %v311_v46 = vadd.f32 %v1246_v44, %v310_v37 }
  0xec   : > { %v313_v39 = vpop.f32.mrb[3].mxu1  ;;  %v322_v48 = vadd.f32 %v919_v38, %v1246_v44 }
  0xed   : > { %v314_v51 = vadd.f32 %v1246_v44, %v313_v39 }
  0xf1   : > { %v922_v40 = vpop.f32.mrb[4].mxu1 }
  0xf2   : > { %v326_v41 = vpop.f32.mrb[5].mxu1  ;;  %v335_v57 = vadd.f32 %v922_v40, %v1246_v44 }
  0xf3   : > { %v923_v42 = vpop.f32.mrb[6].mxu1  ;;  %v327_v58 = vadd.f32 %v1246_v44, %v326_v41 }
  0xf4   : > { %v329_v43 = vpop.f32.mrb[7].mxu1  ;;  %v338_v60 = vadd.f32 %v923_v42, %v1246_v44 }
  0xf5   : > { %v330_v63 = vadd.f32 %v1246_v44, %v329_v43 }
  0xfa   : > { %v954_v47 = vpop.f32.mrb[0].mxu0 }
  0xfb   : > { %v1251_v49 = vadd.f32 %v954_v47, %v319_v45  ;;  %v538_v50 = vpop.f32.mrb[1].mxu0 }
  0xfc   : > { %v1254_v52 = vadd.f32 %v538_v50, %v311_v46  ;;  %v955_v53 = vpop.f32.mrb[2].mxu0 }
  0xfd   : > { %v1256_v54 = vadd.f32 %v955_v53, %v322_v48  ;;  %v541_v55 = vpop.f32.mrb[3].mxu0  ;;  %621 = vrot.lane.b32.xlu1 %v1251_v49, %s1136_s28 }
  0xfe   : > { %v1260_v56 = vadd.f32 %v541_v55, %v314_v51  ;;  %617 = vrot.lane.b32.xlu0 %v1254_v52, %s1136_s28 }
 0x101   : > { %623 = vrot.lane.b32.xlu1 %v1256_v54, %s1136_s28 }
 0x102   : > { %v958_v59 = vpop.f32.mrb[4].mxu0  ;;  %619 = vrot.lane.b32.xlu0 %v1260_v56, %s1136_s28 }
 0x103   : > { %v1271_v61 = vadd.f32 %v958_v59, %v335_v57  ;;  %v554_v62 = vpop.f32.mrb[5].mxu0 }
 0x104   : > { %v1274_v0 = vadd.f32 %v554_v62, %v327_v58  ;;  %v959_v1 = vpop.f32.mrb[6].mxu0 }
 0x105   : > { %v1276_v2 = vadd.f32 %v959_v1, %v338_v60  ;;  %v557_v3 = vpop.f32.mrb[7].mxu0 }
 0x106   : > { %v1278_v4 = vadd.f32 %v557_v3, %v330_v63  ;;  %629 = vrot.lane.b32.xlu0 %v1271_v61, %s1136_s28 }
 0x107   : > { %631 = vrot.lane.b32.xlu1 %v1276_v2, %s1136_s28 }
 0x109   : > { %v944_v5 = vpop.f32.mrb[8].mxu1 }
 0x10a   : > { %v986_v6 = vadd.f32 %v944_v5, %v1246_v44  ;;  %v962_v7 = vpop.f32.mrb[8].mxu0  ;;  %625 = vrot.lane.b32.xlu0 %v1274_v0, %s1136_s28  ;;  %v448_v8 = vpop.f32.mrb[9].mxu1 }
 0x10b   : > { %v988_v9 = vadd.f32 %v1246_v44, %v448_v8  ;;  %v570_v10 = vpop.f32.mrb[9].mxu0  ;;  %627 = vrot.lane.b32.xlu1 %v1278_v4, %s1136_s28  ;;  %v945_v11 = vpop.f32.mrb[10].mxu1 }
 0x10c   : > { %v1290_v12 = vadd.f32 %v986_v6, %v962_v7  ;;  %v990_v13 = vadd.f32 %v945_v11, %v1246_v44  ;;  %v963_v14 = vpop.f32.mrb[10].mxu0  ;;  %v451_v15 = vpop.f32.mrb[11].mxu1 }
 0x10d   : > { %v1293_v16 = vadd.f32 %v988_v9, %v570_v10  ;;  %v992_v17 = vadd.f32 %v1246_v44, %v451_v15  ;;  %v573_v18 = vpop.f32.mrb[11].mxu0 }
 0x10e   : > { %v1296_v19 = vadd.f32 %v990_v13, %v963_v14  ;;  %637 = vrot.lane.b32.xlu0 %v1290_v12, %s1136_s28 }
 0x10f   : > { %v1300_v20 = vadd.f32 %v992_v17, %v573_v18 }
 0x110   : > { %639 = vrot.lane.b32.xlu1 %v1296_v19, %s1136_s28 }
 0x111   : > { %v948_v21 = vpop.f32.mrb[12].mxu1 }
 0x112   : > { %v994_v22 = vadd.f32 %v948_v21, %v1246_v44  ;;  %v966_v23 = vpop.f32.mrb[12].mxu0  ;;  %v464_v24 = vpop.f32.mrb[13].mxu1  ;;  %633 = vrot.lane.b32.xlu0 %v1293_v16, %s1136_s28 }
 0x113   : > { %v996_v25 = vadd.f32 %v1246_v44, %v464_v24  ;;  %v586_v26 = vpop.f32.mrb[13].mxu0  ;;  %v949_v27 = vpop.f32.mrb[14].mxu1 }
 0x114   : > { %v1308_v28 = vadd.f32 %v994_v22, %v966_v23  ;;  %v998_v29 = vadd.f32 %v949_v27, %v1246_v44  ;;  %v967_v30 = vpop.f32.mrb[14].mxu0  ;;  %v467_v31 = vpop.f32.mrb[15].mxu1  ;;  %635 = vrot.lane.b32.xlu1 %v1300_v20, %s1136_s28 }
 0x115   : > { %v1313_v32 = vadd.f32 %v996_v25, %v586_v26  ;;  %v1000_v33 = vadd.f32 %v1246_v44, %v467_v31  ;;  %v589_v34 = vpop.f32.mrb[15].mxu0 }
 0x116   : > { %v1316_v35 = vadd.f32 %v998_v29, %v967_v30 }
 0x117   : > { %v1318_v36 = vadd.f32 %v1000_v33, %v589_v34  ;;  %641 = vrot.lane.b32.xlu0 %v1313_v32, %s1136_s28 }
 0x119   : > { %643 = vrot.lane.b32.xlu1 %v1318_v36, %s1136_s28 }
 0x11b   : > { %645 = vrot.lane.b32.xlu0 %v1308_v28, %s1136_s28 }
 0x11d   : > { %647 = vrot.lane.b32.xlu1 %v1316_v35, %s1136_s28 }
 0x16f   : > { %v622_v37 = vpop.permute.xlu1 %621 }
 0x170   : > { %v651_v38 = vsub.f32 0.0, %v622_v37  ;;  %v618_v39 = vpop.permute.xlu0 %617 }
 0x171   : > { %v649_v40 = vsub.f32 0.0, %v618_v39 }
 0x172   : > { %v669_v41 = vmul.f32 1.442695, %v651_v38 }
 0x173   : > { %v665_v42 = vmul.f32 1.442695, %v649_v40  ;;  %v624_v43 = vpop.permute.xlu1 %623 }
 0x174   : > { %1048 = vpow2.f32 %v669_v41  ;;  %v652_v44 = vsub.f32 0.0, %v624_v43  ;;  %v620_v45 = vpop.permute.xlu0 %619 }
 0x175   : > { %1050 = vpow2.f32 %v665_v42  ;;  %v650_v46 = vsub.f32 0.0, %v620_v45 }
 0x176   : > { %v671_v47 = vmul.f32 1.442695, %v652_v44 }
 0x177   : > { %v667_v48 = vmul.f32 1.442695, %v650_v46 }
 0x178   : > { %1052 = vpow2.f32 %v671_v47  ;;  %v630_v50 = vpop.permute.xlu0 %629 }
 0x179   : > { %1054 = vpow2.f32 %v667_v48  ;;  %v655_v51 = vsub.f32 0.0, %v630_v50  ;;  %v632_v53 = vpop.permute.xlu1 %631 }
 0x17a   : > { %v656_v55 = vsub.f32 0.0, %v632_v53 }
 0x17b   : > { %v677_v57 = vmul.f32 1.442695, %v655_v51 }
 0x17c   : > { %v679_v58 = vmul.f32 1.442695, %v656_v55  ;;  %v626_v59 = vpop.permute.xlu0 %625 }
 0x17d   : > { %1056 = vpow2.f32 %v677_v57  ;;  %v653_v60 = vsub.f32 0.0, %v626_v59  ;;  %v628_v62 = vpop.permute.xlu1 %627 }
 0x17e   : > { %v1049_v63 = vpop.eup %1048  ;;  %1058 = vpow2.f32 %v679_v58  ;;  %v654_v1 = vsub.f32 0.0, %v628_v62 }
 0x17f   : > { %v1051_v3 = vpop.eup %1050  ;;  %v699_v5 = vadd.f32 1.0, %v1049_v63  ;;  %v673_v6 = vmul.f32 1.442695, %v653_v60 }
 0x180   : > { %v697_v7 = vadd.f32 1.0, %v1051_v3  ;;  %v675_v8 = vmul.f32 1.442695, %v654_v1  ;;  %v638_v9 = vpop.permute.xlu0 %637 }
 0x181   : > { %1060 = vrcp.f32 %v699_v5  ;;  %v659_v10 = vsub.f32 0.0, %v638_v9 }
 0x182   : > { %v1053_v11 = vpop.eup %1052  ;;  %1062 = vrcp.f32 %v697_v7  ;;  %v640_v13 = vpop.permute.xlu1 %639 }
 0x183   : > { %v1055_v14 = vpop.eup %1054  ;;  %v700_v15 = vadd.f32 1.0, %v1053_v11  ;;  %1064 = vpow2.f32 %v673_v6  ;;  %v685_v17 = vmul.f32 1.442695, %v659_v10  ;;  %v660_v18 = vsub.f32 0.0, %v640_v13 }
 0x184   : > { %v698_v21 = vadd.f32 1.0, %v1055_v14  ;;  %1066 = vpow2.f32 %v675_v8  ;;  %v634_v22 = vpop.permute.xlu0 %633 }
 0x185   : > { %1068 = vrcp.f32 %v700_v15  ;;  %v687_v23 = vmul.f32 1.442695, %v660_v18  ;;  %v657_v24 = vsub.f32 0.0, %v634_v22 }
 0x186   : > { %1070 = vrcp.f32 %v698_v21  ;;  %v636_v25 = vpop.permute.xlu1 %635 }
 0x187   : > { %v1057_v26 = vpop.eup %1056  ;;  %1072 = vpow2.f32 %v685_v17  ;;  %v681_v27 = vmul.f32 1.442695, %v657_v24  ;;  %v658_v29 = vsub.f32 0.0, %v636_v25 }
 0x188   : > { %v1059_v30 = vpop.eup %1058  ;;  %v703_v31 = vadd.f32 1.0, %v1057_v26  ;;  %1074 = vpow2.f32 %v687_v23 }
 0x189   : > { %v704_v33 = vadd.f32 1.0, %v1059_v30  ;;  %1076 = vpow2.f32 %v681_v27  ;;  %v683_v34 = vmul.f32 1.442695, %v658_v29  ;;  %v642_v37 = vpop.permute.xlu0 %641 }
 0x18a   : > { %1078 = vrcp.f32 %v703_v31  ;;  %v661_v38 = vsub.f32 0.0, %v642_v37 }
 0x18b   : > { %v1061_v39 = vpop.eup %1060  ;;  %1080 = vrcp.f32 %v704_v33  ;;  %v644_v40 = vpop.permute.xlu1 %643 }
 0x18c   : > { %v1063_v41 = vpop.eup %1062  ;;  %v731_v42 = vmul.f32 %v1061_v39, %v1251_v49  ;;  %1082 = vpow2.f32 %v683_v34  ;;  %v689_v43 = vmul.f32 1.442695, %v661_v38  ;;  %v662_v44 = vsub.f32 0.0, %v644_v40 }
 0x18d   : > { %v1065_v45 = vpop.eup %1064  ;;  %v729_v46 = vmul.f32 %v1063_v41, %v1254_v52  ;;  %v646_v47 = vpop.permute.xlu0 %645 }
 0x18e   : > { %v1067_v48 = vpop.eup %1066  ;;  %748 = vst.msk [vmem:[%s1332_s5 + $0x10] sm:$0xff] %vm745_vm2, %v731_v42  ;;  %v701_v50 = vadd.f32 1.0, %v1065_v45  ;;  %1084 = vpow2.f32 %v689_v43  ;;  %v691_v51 = vmul.f32 1.442695, %v662_v44  ;;  %v663_v53 = vsub.f32 0.0, %v646_v47 }
 0x18f   : > { %v1069_v55 = vpop.eup %1068  ;;  %746 = vst.msk [vmem:[%s1332_s5] sm:$0xff] %vm745_vm2, %v729_v46  ;;  %v702_v49 = vadd.f32 1.0, %v1067_v48  ;;  %v648_v57 = vpop.permute.xlu1 %647 }
 0x190   : > { %v1071_v58 = vpop.eup %1070  ;;  %v732_v59 = vmul.f32 %v1069_v55, %v1256_v54  ;;  %1086 = vrcp.f32 %v701_v50  ;;  %v693_v52 = vmul.f32 1.442695, %v663_v53  ;;  %v664_v60 = vsub.f32 0.0, %v648_v57 }
 0x191   : > { %v1073_v62 = vpop.eup %1072  ;;  %v730_v63 = vmul.f32 %v1071_v58, %v1260_v56  ;;  %1088 = vrcp.f32 %v702_v49 }
 0x192   : > { %v1075_v1 = vpop.eup %1074  ;;  %749 = vst.msk [vmem:[%s1332_s5 + $0x18] sm:$0xff] %vm745_vm2, %v732_v59  ;;  %v707_v3 = vadd.f32 1.0, %v1073_v62  ;;  %1090 = vpow2.f32 %v691_v51  ;;  %v695_v54 = vmul.f32 1.442695, %v664_v60 }
 0x193   : > { %v1077_v5 = vpop.eup %1076  ;;  %747 = vst.msk [vmem:[%s1332_s5 + $0x8] sm:$0xff] %vm745_vm2, %v730_v63  ;;  %v708_v6 = vadd.f32 1.0, %v1075_v1  ;;  %1092 = vpow2.f32 %v693_v52 }
 0x194   : > { %v1079_v7 = vpop.eup %1078  ;;  %1094 = vrcp.f32 %v707_v3  ;;  %v705_v8 = vadd.f32 1.0, %v1077_v5 }
 0x195   : > { %v1081_v9 = vpop.eup %1080  ;;  %v735_v56 = vmul.f32 %v1079_v7, %v1271_v61  ;;  %1096 = vrcp.f32 %v708_v6 }
 0x196   : > { %v1083_v10 = vpop.eup %1082  ;;  %v736_v11 = vmul.f32 %v1081_v9, %v1276_v2  ;;  %1098 = vrcp.f32 %v705_v8 }
 0x197   : > { %752 = vst.msk [vmem:[%s1332_s5 + $0x30] sm:$0xff] %vm745_vm2, %v735_v56  ;;  %v706_v13 = vadd.f32 1.0, %v1083_v10  ;;  %1100 = vpow2.f32 %v695_v54 }
 0x198   : > { %v1085_v14 = vpop.eup %1084  ;;  %753 = vst.msk [vmem:[%s1332_s5 + $0x38] sm:$0xff] %vm745_vm2, %v736_v11 }
 0x199   : > { %1102 = vrcp.f32 %v706_v13  ;;  %v709_v15 = vadd.f32 1.0, %v1085_v14 }
 0x19a   : > { %v1087_v17 = vpop.eup %1086 }
 0x19b   : > { %v1089_v18 = vpop.eup %1088  ;;  %v733_v61 = vmul.f32 %v1087_v17, %v1274_v0  ;;  %1104 = vrcp.f32 %v709_v15 }
 0x19c   : > { %v1091_v21 = vpop.eup %1090  ;;  %v734_v2 = vmul.f32 %v1089_v18, %v1278_v4 }
 0x19d   : > { %v1093_v22 = vpop.eup %1092  ;;  %750 = vst.msk [vmem:[%s1332_s5 + $0x20] sm:$0xff] %vm745_vm2, %v733_v61  ;;  %v710_v23 = vadd.f32 1.0, %v1091_v21 }
 0x19e   : > { %v1095_v24 = vpop.eup %1094  ;;  %751 = vst.msk [vmem:[%s1332_s5 + $0x28] sm:$0xff] %vm745_vm2, %v734_v2  ;;  %v711_v25 = vadd.f32 1.0, %v1093_v22 }
 0x19f   : > { %v1097_v26 = vpop.eup %1096  ;;  %v739_v27 = vmul.f32 %v1095_v24, %v1290_v12  ;;  %1106 = vrcp.f32 %v710_v23 }
 0x1a0   : > { %v1099_v0 = vpop.eup %1098  ;;  %v740_v29 = vmul.f32 %v1097_v26, %v1296_v19  ;;  %1108 = vrcp.f32 %v711_v25 }
 0x1a1   : > { %v1101_v4 = vpop.eup %1100  ;;  %756 = vst.msk [vmem:[%s1332_s5 + $0x50] sm:$0xff] %vm745_vm2, %v739_v27  ;;  %v737_v30 = vmul.f32 %v1099_v0, %v1293_v16 }
 0x1a2   : > { %757 = vst.msk [vmem:[%s1332_s5 + $0x58] sm:$0xff] %vm745_vm2, %v740_v29  ;;  %v712_v31 = vadd.f32 1.0, %v1101_v4 }
 0x1a3   : > { %v1103_v33 = vpop.eup %1102  ;;  %754 = vst.msk [vmem:[%s1332_s5 + $0x40] sm:$0xff] %vm745_vm2, %v737_v30 }
 0x1a4   : > { %v738_v12 = vmul.f32 %v1103_v33, %v1300_v20  ;;  %1110 = vrcp.f32 %v712_v31 }
 0x1a5   : > { %v1105_v34 = vpop.eup %1104 }
 0x1a6   : > { %755 = vst.msk [vmem:[%s1332_s5 + $0x48] sm:$0xff] %vm745_vm2, %v738_v12  ;;  %v741_v19 = vmul.f32 %v1105_v34, %v1313_v32 }
 0x1a8   : > { %758 = vst.msk [vmem:[%s1332_s5 + $0x60] sm:$0xff] %vm745_vm2, %v741_v19 }
 0x1a9   : > { %v1107_v37 = vpop.eup %1106 }
 0x1aa   : > { %v1109_v16 = vpop.eup %1108  ;;  %v742_v38 = vmul.f32 %v1107_v37, %v1318_v36 }
 0x1ab   : > { %v743_v39 = vmul.f32 %v1109_v16, %v1308_v28 }
 0x1ac   : > { %759 = vst.msk [vmem:[%s1332_s5 + $0x68] sm:$0xff] %vm745_vm2, %v742_v38 }
 0x1ad   : > { %760 = vst.msk [vmem:[%s1332_s5 + $0x70] sm:$0xff] %vm745_vm2, %v743_v39 }
 0x1ae   : > { %v1111_v40 = vpop.eup %1110 }
 0x1af   : > { %v744_v20 = vmul.f32 %v1111_v40, %v1316_v35 }
 0x1b1   : > { %761 = vst.msk [vmem:[%s1332_s5 + $0x78] sm:$0xff] %vm745_vm2, %v744_v20 }
 0x1b2 PF: > { %s13_s14 = sadd.s32 1, %s1134_s14   ;;  %s1395_s12 = smov %s1130_s13 }
 0x1b3   : > { %p10_p5 = scmp.ge.s32.totalorder %s13_s14, 4   ;;  %s1396_s13 = smov %s1398_s15 }
 0x1b5   :  { %12 = sbr.rel (!%p10_p5) target bundleno = 2 (0x2), region = 64 }

</bundles_post_ra>
